<compile_context>
chip_gen: v6e
topology: v6e:2x2x1
jax: 0.10.0
libtpu: 0.0.40
codegen_flags: <defaults>
</compile_context>

<pallas_src>
import jax
import jax.numpy as jnp
from jax.experimental import pallas as pl
from jax.experimental.pallas import tpu as pltpu


def _round_up(x, m):
    return ((x + m - 1) // m) * m


def _mf_gather_kernel(uid_ref, iid_ref, uemb_hbm, iemb_hbm, out_ref,
                      u_scr, i_scr, sem):
    # uid_ref / iid_ref : (num_tiles, TB) int32 in SMEM (scalar-prefetched ids)
    # uemb_hbm          : (n_users, F)    f32 raw HBM ref
    # iemb_hbm          : (n_items, F)    f32 raw HBM ref
    # out_ref           : (TB, 1)         f32 output block for this tile
    # u_scr / i_scr     : (TB, F)         f32 VMEM scratch (gathered rows)
    # sem               : DMA semaphores, shape (2,)
    t = pl.program_id(0)
    tb = u_scr.shape[0]

    # Issue one row DMA per batch element for each table (HBM -> VMEM gather).
    @pl.loop(0, tb)
    def _(b):
        u_row = uid_ref[t, b]
        i_row = iid_ref[t, b]
        pltpu.make_async_copy(uemb_hbm.at[pl.ds(u_row, 1), :],
                              u_scr.at[pl.ds(b, 1), :], sem.at[0]).start()
        pltpu.make_async_copy(iemb_hbm.at[pl.ds(i_row, 1), :],
                              i_scr.at[pl.ds(b, 1), :], sem.at[1]).start()

    # Wait for all 2*TB row copies.  The wait only needs shape-matched
    # descriptors on the same semaphore (source index is irrelevant).
    @pl.loop(0, tb)
    def _(b):
        pltpu.make_async_copy(uemb_hbm.at[pl.ds(0, 1), :],
                              u_scr.at[pl.ds(b, 1), :], sem.at[0]).wait()
        pltpu.make_async_copy(iemb_hbm.at[pl.ds(0, 1), :],
                              i_scr.at[pl.ds(b, 1), :], sem.at[1]).wait()

    # Row-wise dot product: elementwise (VPU) multiply, reduce over the
    # factor (lane) axis (XLU) -> (TB, 1).
    out_ref[...] = jnp.sum(u_scr[...] * i_scr[...], axis=1, keepdims=True)


def matrix_factorization_forward(user_ids, item_ids, user_factors, item_factors,
                                 *, tile_batch=256):
    """Pallas equivalent of (user_factors(user) * item_factors(item)).sum(1)."""
    batch = int(user_ids.shape[0])
    n_users, n_factors = user_factors.shape
    n_items, n_factors_i = item_factors.shape
    assert n_factors == n_factors_i

    user_factors = user_factors.astype(jnp.float32)
    item_factors = item_factors.astype(jnp.float32)

    # Clamp indices so no out-of-range row is ever gathered (torch would raise).
    user_ids = jnp.clip(user_ids.astype(jnp.int32), 0, n_users - 1)
    item_ids = jnp.clip(item_ids.astype(jnp.int32), 0, n_items - 1)

    # ---- batch-tile selection -------------------------------------------
    tb = min(int(tile_batch), batch)
    tb = max(8, _round_up(tb, 8))
    # If the whole batch fits in one tile but is big enough, split it in two
    # so both v7x TensorCores get work under "parallel" grid semantics.
    if pl.cdiv(batch, tb) == 1 and batch >= 32:
        tb = max(8, _round_up(pl.cdiv(batch, 2), 8))
    num_tiles = pl.cdiv(batch, tb)
    padded = num_tiles * tb
    if padded != batch:
        pad = padded - batch
        user_ids = jnp.pad(user_ids, (0, pad))   # pads with 0 (valid row)
        item_ids = jnp.pad(item_ids, (0, pad))

    uid2 = user_ids.reshape(num_tiles, tb)
    iid2 = item_ids.reshape(num_tiles, tb)

    # ---- explicit VMEM budget (review: set vmem_limit_bytes) -------------
    f_pad = _round_up(n_factors, 128)                 # lane padding of scratch
    scratch_bytes = 2 * tb * f_pad * 4                # two (TB, F) f32 buffers
    out_bytes = 2 * tb * 128 * 4                      # (TB, 1) block, 2 buffers
    vmem_limit = int(min(60 << 20, max(8 << 20, 2 * (scratch_bytes + out_bytes))))

    grid_spec = pltpu.PrefetchScalarGridSpec(
        num_scalar_prefetch=2,                         # uid2, iid2 -> SMEM
        grid=(num_tiles,),
        in_specs=[
            pl.BlockSpec(memory_space=pl.ANY),         # user table stays in HBM
            pl.BlockSpec(memory_space=pl.ANY),         # item table stays in HBM
        ],
        out_specs=pl.BlockSpec((tb, 1), lambda t, uids, iids: (t, 0)),
        scratch_shapes=[
            pltpu.VMEM((tb, n_factors), jnp.float32),  # gathered user rows
            pltpu.VMEM((tb, n_factors), jnp.float32),  # gathered item rows
            pltpu.SemaphoreType.DMA((2,)),
        ],
    )

    out2d = pl.pallas_call(
        _mf_gather_kernel,
        out_shape=jax.ShapeDtypeStruct((padded, 1), jnp.float32),
        grid_spec=grid_spec,
        compiler_params=pltpu.CompilerParams(
            dimension_semantics=("parallel",),
            vmem_limit_bytes=vmem_limit),
    )(uid2, iid2, user_factors, item_factors)

    return out2d.reshape(-1)[:batch]


if __name__ == "__main__":
    # Small, deterministic synthetic setup (mirrors torch.nn.Embedding ~ N(0,1)).
    n_users, n_items, n_factors = 16, 32, 32
    batch = 8

    key = jax.random.PRNGKey(0)
    k_u, k_i, k_uid, k_iid = jax.random.split(key, 4)

    user_factors = jax.random.normal(k_u, (n_users, n_factors), dtype=jnp.float32)
    item_factors = jax.random.normal(k_i, (n_items, n_factors), dtype=jnp.float32)

    user_ids = jax.random.randint(k_uid, (batch,), 0, n_users, dtype=jnp.int32)
    item_ids = jax.random.randint(k_iid, (batch,), 0, n_items, dtype=jnp.int32)

    out = matrix_factorization_forward(user_ids, item_ids, user_factors, item_factors)
    out = jax.block_until_ready(out)

    # Reference (plain JAX) check of the forward semantics.
    ref = jnp.sum(user_factors[user_ids] * item_factors[item_ids], axis=1)
    assert out.shape == (batch,)
    assert jnp.allclose(out, ref, atol=1e-5, rtol=1e-5), (out, ref)

    print("KERNEL_OK")
</pallas_src>

<mosaic_0001>
module attributes {stable_mosaic.version = 11 : i64} {
  func.func @_mf_gather_kernel(%arg0: i32, %arg1: memref<1x8xi32, #tpu.memory_space<smem>>, %arg2: memref<1x8xi32, #tpu.memory_space<smem>>, %arg3: memref<16x32xf32, #tpu.memory_space<any>>, %arg4: memref<32x32xf32, #tpu.memory_space<any>>, %arg5: memref<8x1xf32, #tpu.memory_space<vmem>>, %arg6: memref<8x32xf32, #tpu.memory_space<vmem>>, %arg7: memref<8x32xf32, #tpu.memory_space<vmem>>, %arg8: memref<2x!tpu.dma_semaphore, #tpu.memory_space<semaphore_mem>>) attributes {dimension_semantics = [#tpu.dimension_semantics<parallel>], iteration_bounds = array<i64: 1>, scalar_prefetch = 2 : i64, scratch_operands = 3 : i64, tpu.core_type = #tpu.core_type<tc>, window_params = [{}, {}, {transform_indices = @transform_2, window_bounds = array<i64: 8, 1>}]} {
    %c0_i32 = arith.constant 0 : i32
    %c8_i32 = arith.constant 8 : i32
    %0 = arith.addi %c0_i32, %c8_i32 : i32
    %c1_i32 = arith.constant 1 : i32
    scf.for %arg9 = %c0_i32 to %0 step %c1_i32  : i32 {
      %c1_i32_10 = arith.constant 1 : i32
      %8 = arith.muli %arg9, %c1_i32_10 : i32
      %c0_i32_11 = arith.constant 0 : i32
      %9 = arith.addi %c0_i32_11, %8 : i32
      %10 = arith.index_cast %arg0 : i32 to index
      %11 = arith.index_cast %9 : i32 to index
      %12 = memref.load %arg1[%10, %11] : memref<1x8xi32, #tpu.memory_space<smem>>
      %13 = arith.index_cast %arg0 : i32 to index
      %14 = arith.index_cast %9 : i32 to index
      %15 = memref.load %arg2[%13, %14] : memref<1x8xi32, #tpu.memory_space<smem>>
      %c0_i32_12 = arith.constant 0 : i32
      %c0_i32_13 = arith.constant 0 : i32
      %16 = tpu.memref_slice %arg3[%12, %c0_i32_13] : memref<16x32xf32, #tpu.memory_space<any>> -> memref<1x32xf32, #tpu.memory_space<any>>
      %c0_i32_14 = arith.constant 0 : i32
      %17 = tpu.memref_slice %arg6[%9, %c0_i32_14] : memref<8x32xf32, #tpu.memory_space<vmem>> -> memref<1x32xf32, #tpu.memory_space<vmem>>
      %18 = tpu.memref_slice %arg8[%c0_i32_12] : memref<2x!tpu.dma_semaphore, #tpu.memory_space<semaphore_mem>> -> memref<1x!tpu.dma_semaphore, #tpu.memory_space<semaphore_mem>>
      %19 = tpu.memref_squeeze %18 : memref<1x!tpu.dma_semaphore, #tpu.memory_space<semaphore_mem>> -> memref<!tpu.dma_semaphore, #tpu.memory_space<semaphore_mem>>
      tpu.enqueue_dma source(%16 : memref<1x32xf32, #tpu.memory_space<any>>) target(%17 : memref<1x32xf32, #tpu.memory_space<vmem>>) target_semaphore(%19 : memref<!tpu.dma_semaphore, #tpu.memory_space<semaphore_mem>>)
      %c1_i32_15 = arith.constant 1 : i32
      %c0_i32_16 = arith.constant 0 : i32
      %20 = tpu.memref_slice %arg4[%15, %c0_i32_16] : memref<32x32xf32, #tpu.memory_space<any>> -> memref<1x32xf32, #tpu.memory_space<any>>
      %c0_i32_17 = arith.constant 0 : i32
      %21 = tpu.memref_slice %arg7[%9, %c0_i32_17] : memref<8x32xf32, #tpu.memory_space<vmem>> -> memref<1x32xf32, #tpu.memory_space<vmem>>
      %22 = tpu.memref_slice %arg8[%c1_i32_15] : memref<2x!tpu.dma_semaphore, #tpu.memory_space<semaphore_mem>> -> memref<1x!tpu.dma_semaphore, #tpu.memory_space<semaphore_mem>>
      %23 = tpu.memref_squeeze %22 : memref<1x!tpu.dma_semaphore, #tpu.memory_space<semaphore_mem>> -> memref<!tpu.dma_semaphore, #tpu.memory_space<semaphore_mem>>
      tpu.enqueue_dma source(%20 : memref<1x32xf32, #tpu.memory_space<any>>) target(%21 : memref<1x32xf32, #tpu.memory_space<vmem>>) target_semaphore(%23 : memref<!tpu.dma_semaphore, #tpu.memory_space<semaphore_mem>>)
    }
    %c8_i32_0 = arith.constant 8 : i32
    %c0_i32_1 = arith.constant 0 : i32
    %c8_i32_2 = arith.constant 8 : i32
    %1 = arith.addi %c0_i32_1, %c8_i32_2 : i32
    %c1_i32_3 = arith.constant 1 : i32
    scf.for %arg9 = %c0_i32_1 to %1 step %c1_i32_3  : i32 {
      %c1_i32_10 = arith.constant 1 : i32
      %8 = arith.muli %arg9, %c1_i32_10 : i32
      %c0_i32_11 = arith.constant 0 : i32
      %9 = arith.addi %c0_i32_11, %8 : i32
      %c0_i32_12 = arith.constant 0 : i32
      %c0_i32_13 = arith.constant 0 : i32
      %c0_i32_14 = arith.constant 0 : i32
      %10 = tpu.memref_slice %arg3[%c0_i32_13, %c0_i32_14] : memref<16x32xf32, #tpu.memory_space<any>> -> memref<1x32xf32, #tpu.memory_space<any>>
      %c0_i32_15 = arith.constant 0 : i32
      %11 = tpu.memref_slice %arg6[%9, %c0_i32_15] : memref<8x32xf32, #tpu.memory_space<vmem>> -> memref<1x32xf32, #tpu.memory_space<vmem>>
      %12 = tpu.memref_slice %arg8[%c0_i32_12] : memref<2x!tpu.dma_semaphore, #tpu.memory_space<semaphore_mem>> -> memref<1x!tpu.dma_semaphore, #tpu.memory_space<semaphore_mem>>
      %13 = tpu.memref_squeeze %12 : memref<1x!tpu.dma_semaphore, #tpu.memory_space<semaphore_mem>> -> memref<!tpu.dma_semaphore, #tpu.memory_space<semaphore_mem>>
      tpu.wait_dma2 semaphore(%13 : memref<!tpu.dma_semaphore, #tpu.memory_space<semaphore_mem>>) src(%10 : memref<1x32xf32, #tpu.memory_space<any>>) dst(%11 : memref<1x32xf32, #tpu.memory_space<vmem>>)
      %c1_i32_16 = arith.constant 1 : i32
      %c0_i32_17 = arith.constant 0 : i32
      %c0_i32_18 = arith.constant 0 : i32
      %14 = tpu.memref_slice %arg4[%c0_i32_17, %c0_i32_18] : memref<32x32xf32, #tpu.memory_space<any>> -> memref<1x32xf32, #tpu.memory_space<any>>
      %c0_i32_19 = arith.constant 0 : i32
      %15 = tpu.memref_slice %arg7[%9, %c0_i32_19] : memref<8x32xf32, #tpu.memory_space<vmem>> -> memref<1x32xf32, #tpu.memory_space<vmem>>
      %16 = tpu.memref_slice %arg8[%c1_i32_16] : memref<2x!tpu.dma_semaphore, #tpu.memory_space<semaphore_mem>> -> memref<1x!tpu.dma_semaphore, #tpu.memory_space<semaphore_mem>>
      %17 = tpu.memref_squeeze %16 : memref<1x!tpu.dma_semaphore, #tpu.memory_space<semaphore_mem>> -> memref<!tpu.dma_semaphore, #tpu.memory_space<semaphore_mem>>
      tpu.wait_dma2 semaphore(%17 : memref<!tpu.dma_semaphore, #tpu.memory_space<semaphore_mem>>) src(%14 : memref<1x32xf32, #tpu.memory_space<any>>) dst(%15 : memref<1x32xf32, #tpu.memory_space<vmem>>)
    }
    %c8_i32_4 = arith.constant 8 : i32
    %c0 = arith.constant 0 : index
    %c0_5 = arith.constant 0 : index
    %2 = vector.load %arg6[%c0, %c0_5] : memref<8x32xf32, #tpu.memory_space<vmem>>, vector<8x32xf32>
    %c0_6 = arith.constant 0 : index
    %c0_7 = arith.constant 0 : index
    %3 = vector.load %arg7[%c0_6, %c0_7] : memref<8x32xf32, #tpu.memory_space<vmem>>, vector<8x32xf32>
    %4 = arith.mulf %2, %3 : vector<8x32xf32>
    %cst = arith.constant dense<0.000000e+00> : vector<8xf32>
    %5 = vector.multi_reduction <add>, %4, %cst [1] : vector<8x32xf32> to vector<8xf32>
    %6 = vector.shape_cast %5 : vector<8xf32> to vector<8x1xf32>
    %c0_8 = arith.constant 0 : index
    %c0_9 = arith.constant 0 : index
    %7 = vector.load %arg5[%c0_8, %c0_9] : memref<8x1xf32, #tpu.memory_space<vmem>>, vector<8x1xf32>
    tpu.vector_store %arg5[%c0_8, %c0_9], %6 {strides = array<i32>} : memref<8x1xf32, #tpu.memory_space<vmem>>, vector<8x1xf32>,
    return
  }
  func.func @transform_2(%arg0: i32, %arg1: memref<1x8xi32, #tpu.memory_space<smem>>, %arg2: memref<1x8xi32, #tpu.memory_space<smem>>) -> (i32, i32) {
    %c0_i32 = arith.constant 0 : i32
    %c0_i32_0 = arith.constant 0 : i32
    return %arg0, %c0_i32 : i32, i32
  }
}

</mosaic_0001>

<bundles_post_ra>
// kernel: tpu_custom_call.1
= control target key start
LH: loop header
LB: loop body
LE: loop exit
PB: predicated region body
PF: predicated region fallthrough
CT: control target
= control target key end

     0   :  { %s224_s15 = smov [#allocation6]   ;;  %s301_s0 = inlined_call_operand.hbm [shape: s32[1,8], index: 0, kind: input, shape index: {}]   ;;  %s302_s2 = inlined_call_operand.hbm [shape: f32[16,32], index: 2, kind: input, shape index: {}]   ;;  %s303_s3 = inlined_call_operand.hbm [shape: f32[32,32], index: 3, kind: input, shape index: {}]   ;;  %s304_s4 = inlined_call_operand.vmem [shape: f32[8,1], index: 4, kind: output, shape index: {}]   ;;  %s305_s1 = inlined_call_operand.vmem [shape: s32[1,8], index: 1, kind: input, shape index: {}]  }
   0x1   :  { %10 = dma.hbm_to_smem %s301_s0, 16, %s224_s15, [#allocation5] }
   0x2   :  { %s11_s20 = sshll.u32 %s305_s1, 4  ;;  %s12_s20 = int_to_ptr.vmem [resolvable:$true] %s11_s20 }
   0x3   :  { %s146_s21 = scalar_lea.vmem %s12_s20, 16  ;;  %p151_p1 = scmp.lt.s32.totalorder %s12_s20, %s12_s20 }
   0x4   :  { %p147_p0 = scmp.ne.s32.totalorder %s12_s20, %s146_s21  ;;  %p152_p2 = scmp.lt.s32.totalorder %s146_s21, %s146_s21 }
   0x6   :  { %p153_p3 = por %p152_p2, %p151_p1 }
   0x8   :  { %p154_p4 = pnand %p153_p3, %p147_p0 }
   0xa   :  { %157 = shalt.err (!%p154_p4)  }
   0xb   :  { %s225_s22 = smov [#allocation7]  }
   0xc   :  { %14 = dma.vmem_to_smem %s12_s20, 16, %s225_s22, [#allocation5] }
   0xd   :  { %210 = dma.done.wait [#allocation5], 32 }
   0xe   :  { %211 = vsyncadd [#allocation5], 4294967264 }
   0xf   :  { %16 = sfence }
  0x10   :  { %s259_s23 = smov 0  }
  0x11 LB: > { %s23_s0 = sshra.s32 %s218_s23, 7  ;;  %s28_s1 = sand.u32 127, %s218_s23  ;;  %s218_s23 = sphi %s259_s23, %s22_s23  }
  0x12   : > { %s115_s24 = sshll.u32 %s23_s0, 7  ;;  %s34_s28 = scalar_lea.vmem [#allocation2], %s218_s23 }
  0x13   : > { %s29_s25 = sadd.s32 %s115_s24, %s28_s1  ;;  %s42_s29 = sshll.u32 %s34_s28, 4  ;;  %s43_s29 = int_to_ptr.vmem [resolvable:$true] %s42_s29 }
  0x14   : > { %s30_s26 = sld [smem:[#allocation6 + %s29_s25]]  ;;  %s48_s30 = scalar_lea.vmem [#allocation3], %s218_s23 }
  0x15   : > { %s266_s27 = sld [smem:[#allocation7 + %s29_s25]]  ;;  %s57_s5 = sshll.u32 %s48_s30, 4  ;;  %s270_s5 = int_to_ptr.vmem [resolvable:$true] %s57_s5 }
  0x16   : > { %s160_s14 = scalar_lea.hbm %s302_s2, 256 }
  0x1a   : > { %s116_s6 = sshll.u32 %s30_s26, 4 }
  0x1b   : > { %s33_s9 = scalar_lea.hbm %s302_s2, %s116_s6  ;;  %s117_s10 = sshll.u32 %s266_s27, 4 }
  0x1c   : > { %s158_s11 = scalar_lea.hbm %s33_s9, 16  ;;  %p161_p6 = scmp.lt.s32.totalorder %s33_s9, %s302_s2 }
  0x1d   : > { %p159_p5 = scmp.ne.s32.totalorder %s33_s9, %s158_s11  ;;  %p162_p7 = scmp.lt.s32.totalorder %s160_s14, %s158_s11 }
  0x1f   : > { %p163_p8 = por %p162_p7, %p161_p6 }
  0x21   : > { %p164_p9 = pnand %p163_p8, %p159_p5 }
  0x23   : > { %167 = shalt.err (!%p164_p9)  }
  0x24   : > { %s168_s17 = scalar_lea.vmem %s43_s29, 16  ;;  %s226_s18 = smov [#allocation2]  }
  0x25   : > { %p169_p10 = scmp.ne.s32.totalorder %s43_s29, %s168_s17  ;;  %s170_s19 = sshll.u32 %s226_s18, 4  ;;  %s171_s19 = int_to_ptr.vmem [resolvable:$false] %s170_s19 }
  0x26   : > { %s172_s20 = scalar_lea.vmem %s171_s19, 128  ;;  %p173_p11 = scmp.lt.s32.totalorder %s43_s29, %s171_s19 }
  0x27   : > { %p174_p12 = scmp.lt.s32.totalorder %s172_s20, %s168_s17 }
  0x29   : > { %p175_p13 = por %p174_p12, %p173_p11 }
  0x2b   : > { %p176_p0 = pnand %p175_p13, %p169_p10 }
  0x2d   : > { %179 = shalt.err (!%p176_p0)  }
  0x2e   : > { %45 = dma.hbm_to_vmem [thread:$0]  %s33_s9, 16, %s43_s29, [#allocation4] }
  0x2f   : > { %s47_s0 = scalar_lea.hbm %s303_s3, %s117_s10  ;;  %s182_s26 = scalar_lea.hbm %s303_s3, 512 }
  0x30   : > { %s180_s1 = scalar_lea.hbm %s47_s0, 16  ;;  %p183_p2 = scmp.lt.s32.totalorder %s47_s0, %s303_s3 }
  0x31   : > { %p181_p1 = scmp.ne.s32.totalorder %s47_s0, %s180_s1  ;;  %p184_p3 = scmp.lt.s32.totalorder %s182_s26, %s180_s1 }
  0x33   : > { %p185_p4 = por %p184_p3, %p183_p2 }
  0x35   : > { %p186_p5 = pnand %p185_p4, %p181_p1 }
  0x37   : > { %189 = shalt.err (!%p186_p5)  }
  0x38   : > { %s190_s29 = scalar_lea.vmem %s270_s5, 16  ;;  %s227_s30 = smov [#allocation3]  }
  0x39   : > { %p191_p6 = scmp.ne.s32.totalorder %s270_s5, %s190_s29  ;;  %s192_s6 = sshll.u32 %s227_s30, 4  ;;  %s193_s6 = int_to_ptr.vmem [resolvable:$false] %s192_s6 }
  0x3a   : > { %s194_s7 = scalar_lea.vmem %s193_s6, 128  ;;  %p195_p7 = scmp.lt.s32.totalorder %s270_s5, %s193_s6 }
  0x3b   : > { %p196_p8 = scmp.lt.s32.totalorder %s194_s7, %s190_s29 }
  0x3d   : > { %p197_p9 = por %p196_p8, %p195_p7 }
  0x3f   : > { %p198_p10 = pnand %p197_p9, %p191_p6 }
  0x41   : > { %201 = shalt.err (!%p198_p10)  }
  0x42   : > { %60 = dma.hbm_to_vmem [thread:$0]  %s47_s0, 16, %s270_s5, [#allocation4 + $0x1] }
  0x43   : > { %s22_s23 = sadd.s32 1, %s218_s23  }
  0x44   : > { %p19_p11 = scmp.ge.s32.totalorder %s22_s23, 8  }
  0x45   :  { %s220_s8 = smov (%p19_p11), 0  }
  0x46   :  { %21 = sbr.rel (!%p19_p11) target bundleno = 17 (0x11), region = 49 }
  0x4b LB: > { %212 = dma.done.wait [#allocation4], 16  ;;  %s222_s8 = sphi %s220_s8, %s66_s8  }
  0x4c   : > { %213 = vsyncadd [#allocation4], 4294967280 }
  0x4d   : > { %214 = dma.done.wait [#allocation4 + $0x1], 16 }
  0x4e   : > { %215 = vsyncadd [#allocation4 + $0x1], 4294967280  ;;  %s66_s8 = sadd.s32 1, %s222_s8  }
  0x4f   : > { %p63_p12 = scmp.ge.s32.totalorder %s66_s8, 8  }
  0x50   :  { %v73_v0 = vld [vmem:[#allocation2] sm:$0xff] (%p63_p12)  ;;  %v74_v1 = vld [vmem:[#allocation3] sm:$0xff] (%p63_p12)  ;;  %vm76_vm0 = vcmask (%p63_p12), 261120   ;;  %vm80_vm1 = vcmask (%p63_p12), 7168  }
  0x51   :  { %65 = sbr.rel (!%p63_p12) target bundleno = 75 (0x4b), region = 60  ;;  %v75_v2 = vmul.f32 (%p63_p12), %v74_v1, %v73_v0 }
  0x53   :  { %v77_v3 = vsel (%p63_p12), %vm76_vm0, %v75_v2, 0.0 }
  0x54   :  { %78 = vadd.xlane.f32.xlu0 (%p63_p12), %v77_v3 }
  0xdd   :  { %v79_v4 = vpop.xlane.xlu0 %78 }
  0xde   :  { %81 = vst.msk [vmem:[%s304_s4] sm:$0xff] %vm80_vm1, %v79_v4 }
  0xdf   :  { %86 = vsyncmov [#allocation4] }
  0xe2   :  { %s87_s23 = vpop.sfrf %86 }
  0xe3   :  { %p118_p13 = scmp.ne.s32.totalorder %s87_s23, 0 }
  0xe5   :  { %91 = shalt.err (%p118_p13)  }
  0xe6   :  { %93 = vsyncmov [#allocation4 + $0x1] }
  0xe9   :  { %s94_s5 = vpop.sfrf %93 }
  0xea   :  { %p119_p0 = scmp.ne.s32.totalorder %s94_s5, 0 }
  0xec   :  { %98 = shalt.err (%p119_p0)  }

</bundles_post_ra>
